<compile_context>
chip_gen: v6e
topology: v6e:2x2x1
jax: 0.10.0
libtpu: 0.0.40
codegen_flags: <defaults>
</compile_context>

<pallas_src>
import functools

import jax
import jax.numpy as jnp
from jax.experimental import pallas as pl
from jax.experimental.pallas import tpu as pltpu


def _envelope_kernel(x_ref, o_ref, *, p, a, b, c):
    # Compute in f32 regardless of input dtype; cast back on store.
    x = x_ref[...].astype(jnp.float32)

    # x^(p-1) via static repeated multiplication (p is a Python int >= 1).
    if p - 1 == 0:
        x_p_0 = jnp.ones_like(x)
    else:
        x_p_0 = x
        for _ in range(p - 2):
            x_p_0 = x_p_0 * x

    # 1/x on the EUP (its own VLIW slot -> essentially free next to VPU work).
    inv_x = pl.reciprocal(x, approx=False)

    # Horner form of a*x^(p-1) + b*x^p + c*x^(p+1).
    poly = x_p_0 * (a + x * (b + c * x))

    o_ref[...] = (inv_x + poly).astype(o_ref.dtype)


def envelope(x, exponent, *, tile_rows=4096):
    """Applies the DimeNet envelope elementwise. x: any shape, float dtype."""
    p = exponent + 1
    a = -(p + 1) * (p + 2) / 2.0
    b = float(p * (p + 2))
    c = -p * (p + 1) / 2.0

    orig_shape = x.shape
    orig_dtype = x.dtype
    cols = 128

    # Flatten to a lane-dense 2-D slab; pad only to a multiple of 128.
    flat = x.reshape(-1)
    n = flat.shape[0]
    rows = pl.cdiv(n, cols)
    pad = rows * cols - n
    if pad:
        # Pad with ones so 1/x stays finite on the (discarded) padding.
        flat = jnp.concatenate([flat, jnp.ones((pad,), dtype=orig_dtype)])
    slab = flat.reshape(rows, cols)

    # Small-input fast path: one grid step with block == full slab (no 8-row
    # divisibility requirement when the block equals the full array dims).
    block_rows = rows if rows <= tile_rows else tile_rows
    grid = (pl.cdiv(rows, block_rows),)

    kernel = functools.partial(_envelope_kernel, p=p, a=a, b=b, c=c)

    out = pl.pallas_call(
        kernel,
        out_shape=jax.ShapeDtypeStruct((rows, cols), orig_dtype),
        grid_spec=pltpu.PrefetchScalarGridSpec(
            num_scalar_prefetch=0,
            grid=grid,
            in_specs=[pl.BlockSpec((block_rows, cols), lambda i: (i, 0))],
            out_specs=pl.BlockSpec((block_rows, cols), lambda i: (i, 0)),
        ),
        compiler_params=pltpu.CompilerParams(
            dimension_semantics=("parallel",)
        ),
    )(slab)

    out_flat = out.reshape(-1)
    if pad:
        out_flat = out_flat[:n]
    return out_flat.reshape(orig_shape)


def envelope_ref(x, exponent):
    p = exponent + 1
    a = -(p + 1) * (p + 2) / 2.0
    b = float(p * (p + 2))
    c = -p * (p + 1) / 2.0
    x_p_0 = x ** (p - 1)
    x_p_1 = x_p_0 * x
    x_p_2 = x_p_1 * x
    return 1.0 / x + a * x_p_0 + b * x_p_1 + c * x_p_2


if __name__ == "__main__":
    key = jax.random.PRNGKey(0)
    exponent = 5

    # DimeNet applies Envelope to scaled edge distances in (0, 1]; shape is
    # typically (num_edges, 1). Small deterministic examples.
    k1, k2 = jax.random.split(key)
    x1 = jax.random.uniform(
        k1, (64, 1), dtype=jnp.float32, minval=0.05, maxval=1.0
    )
    # Second case exercises the pad-to-128 path (n not a multiple of 128).
    x2 = jax.random.uniform(
        k2, (300,), dtype=jnp.float32, minval=0.05, maxval=1.0
    )

    ok = True
    for x in (x1, x2):
        out = jax.block_until_ready(envelope(x, exponent))
        ref = envelope_ref(x, exponent)
        ok &= out.shape == x.shape and out.dtype == x.dtype
        ok &= bool(jnp.allclose(out, ref, rtol=1e-5, atol=1e-5))

    assert ok, "mismatch vs reference"
    print("KERNEL_OK")
</pallas_src>

<mosaic_0001>
module attributes {stable_mosaic.version = 11 : i64} {
  func.func @_envelope_kernel(%arg0: i32, %arg1: memref<1x128xf32, #tpu.memory_space<vmem>>, %arg2: memref<1x128xf32, #tpu.memory_space<vmem>>) attributes {dimension_semantics = [#tpu.dimension_semantics<parallel>], iteration_bounds = array<i64: 1>, scalar_prefetch = 0 : i64, scratch_operands = 0 : i64, tpu.core_type = #tpu.core_type<tc>, window_params = [{transform_indices = @transform_0, window_bounds = array<i64: 1, 128>}, {transform_indices = @transform_1, window_bounds = array<i64: 1, 128>}]} {
    %c0 = arith.constant 0 : index
    %c0_0 = arith.constant 0 : index
    %0 = vector.load %arg1[%c0, %c0_0] : memref<1x128xf32, #tpu.memory_space<vmem>>, vector<1x128xf32>
    %1 = arith.mulf %0, %0 : vector<1x128xf32>
    %2 = arith.mulf %1, %0 : vector<1x128xf32>
    %3 = arith.mulf %2, %0 : vector<1x128xf32>
    %4 = arith.mulf %3, %0 : vector<1x128xf32>
    %5 = tpu.reciprocal %0 : vector<1x128xf32> -> vector<1x128xf32>
    %cst = arith.constant -2.100000e+01 : f32
    %6 = vector.broadcast %cst : f32 to vector<1x128xf32>
    %7 = arith.mulf %6, %0 : vector<1x128xf32>
    %cst_1 = arith.constant 4.800000e+01 : f32
    %8 = vector.broadcast %cst_1 : f32 to vector<1x128xf32>
    %9 = arith.addf %8, %7 : vector<1x128xf32>
    %10 = arith.mulf %0, %9 : vector<1x128xf32>
    %cst_2 = arith.constant -2.800000e+01 : f32
    %11 = vector.broadcast %cst_2 : f32 to vector<1x128xf32>
    %12 = arith.addf %11, %10 : vector<1x128xf32>
    %13 = arith.mulf %4, %12 : vector<1x128xf32>
    %14 = arith.addf %5, %13 : vector<1x128xf32>
    %c0_3 = arith.constant 0 : index
    %c0_4 = arith.constant 0 : index
    %15 = vector.load %arg2[%c0_3, %c0_4] : memref<1x128xf32, #tpu.memory_space<vmem>>, vector<1x128xf32>
    tpu.vector_store %arg2[%c0_3, %c0_4], %14 {strides = array<i32>} : memref<1x128xf32, #tpu.memory_space<vmem>>, vector<1x128xf32>,
    return
  }
  func.func @transform_0(%arg0: i32) -> (i32, i32) {
    %c0_i32 = arith.constant 0 : i32
    %c0_i32_0 = arith.constant 0 : i32
    return %arg0, %c0_i32 : i32, i32
  }
  func.func @transform_1(%arg0: i32) -> (i32, i32) {
    %c0_i32 = arith.constant 0 : i32
    %c0_i32_0 = arith.constant 0 : i32
    return %arg0, %c0_i32 : i32, i32
  }
}

</mosaic_0001>

<bundles_post_ra>
// kernel: tpu_custom_call.1
= control target key start
LH: loop header
LB: loop body
LE: loop exit
PB: predicated region body
PF: predicated region fallthrough
CT: control target
= control target key end

     0   :  { %6 = vsyncpa [#allocation3], 0  ;;  %s115_s0 = inlined_call_operand.hbm [shape: f32[1,128], index: 0, kind: input, shape index: {}]   ;;  %s116_s1 = inlined_call_operand.hbm [shape: f32[1,128], index: 1, kind: output, shape index: {}]  }
   0x1   :  { %7 = vsyncpa [#allocation4], 0  ;;  %s97_s6 = smov [#allocation2]  }
   0x2   :  { %s14_s7 = sshll.u32 %s97_s6, 4  ;;  %s15_s7 = int_to_ptr.vmem [resolvable:$true] %s14_s7 }
   0x3   :  { %s61_s8 = scalar_lea.vmem %s15_s7, 16  ;;  %s65_s9 = scalar_lea.vmem %s15_s7, 32 }
   0x4   :  { %p62_p0 = scmp.ne.s32.totalorder %s15_s7, %s61_s8  ;;  %p66_p1 = scmp.lt.s32.totalorder %s15_s7, %s15_s7 }
   0x5   :  { %p67_p2 = scmp.lt.s32.totalorder %s65_s9, %s61_s8 }
   0x7   :  { %p68_p3 = por %p67_p2, %p66_p1 }
   0x9   :  { %p69_p4 = pnand %p68_p3, %p62_p0 }
   0xb   :  { %72 = shalt.err (!%p69_p4)
}
   0xc   :  { %17 = dma.hbm_to_vmem [thread:$0]  %s115_s0, 16, %s15_s7, [#allocation3]  }
   0xd   :  { %93 = dma.done.wait [#allocation3], 16  }
   0xe   :  { %94 = vsyncadd [#allocation3], 4294967280  ;;  %v21_v0 = vld [vmem:[#allocation2] sm:$0x1]  ;;  %s98_s12 = smov [#allocation5]  }
   0xf   :  { %v22_v1 = vmul.f32 %v21_v0, %v21_v0  ;;  %51 = vrcp.f32 %v21_v0  ;;  %v27_v2 = vmul.f32 -21.0, %v21_v0  ;;  %s40_s13 = sshll.u32 %s98_s12, 4  ;;  %s41_s13 = int_to_ptr.vmem [resolvable:$true] %s40_s13 }
  0x10   :  { %s73_s0 = scalar_lea.vmem %s41_s13, 16  ;;  %s77_s14 = scalar_lea.vmem %s41_s13, 32 }
  0x11   :  { %v23_v3 = vmul.f32 %v22_v1, %v21_v0  ;;  %v28_v4 = vadd.f32 48.0, %v27_v2  ;;  %p74_p5 = scmp.ne.s32.totalorder %s41_s13, %s73_s0  ;;  %p78_p6 = scmp.lt.s32.totalorder %s41_s13, %s41_s13 }
  0x12   :  { %p79_p7 = scmp.lt.s32.totalorder %s77_s14, %s73_s0 }
  0x13   :  { %v24_v5 = vmul.f32 %v23_v3, %v21_v0  ;;  %v29_v6 = vmul.f32 %v28_v4, %v21_v0 }
  0x14   :  { %p80_p8 = por %p79_p7, %p78_p6 }
  0x15   :  { %v25_v7 = vmul.f32 %v24_v5, %v21_v0  ;;  %v30_v8 = vadd.f32 -28.0, %v29_v6 }
  0x16   :  { %p81_p9 = pnand %p80_p8, %p74_p5 }
  0x17   :  { %v31_v9 = vmul.f32 %v30_v8, %v25_v7 }
  0x1c   :  { %v52_v10 = vpop.eup %51 }
  0x1d   :  { %v32_v11 = vadd.f32 %v52_v10, %v31_v9 }
  0x1f   :  { %33 = vst [vmem:[#allocation5] sm:$0x1] %v32_v11 }
  0x20   :  { %84 = shalt.err (!%p81_p9)
}
  0x21   :  { %43 = dma.vmem_to_hbm [thread:$0]  %s41_s13, 16, %s116_s1, [#allocation4]  }
  0x22   :  { %95 = dma.done.wait [#allocation4], 16  }
  0x23   :  { %96 = vsyncadd [#allocation4], 4294967280 }
  0x24   :  { %47 = vsyncpa [#allocation3], 1 }
  0x25   :  { %48 = vsyncpa [#allocation4], 1 }

</bundles_post_ra>
